<compile_context>
chip_gen: v7x
topology: tpu7x:2x2x1
jax: 0.10.0
libtpu: 0.0.40
codegen_flags: <defaults>
</compile_context>

<pallas_src>
import jax
import jax.numpy as jnp
from jax.experimental import pallas as pl
from jax.experimental.pallas import tpu as pltpu

_LANES = 128             # vreg lane width -> lane-dense slab width
_PAD_GRAN = 8 * _LANES   # 1024: (8,128) tile granularity for the flat view
_TM_MAX = 2048           # 2048x128 f32 = 1 MiB block per buffer
_TM_MIN = 256            # 256x128 f32 = 128 KiB, keeps per-step overhead amortised
_TARGET_GRID_STEPS = 4   # aim for >=4 grid steps on large N (v7x megacore)
_SMALL_BATCH = 65536     # below this a fused XLA elementwise op beats a kernel launch


def linear_kernel(x_ref, w_ref, b_ref, o_ref):
    # nn.Linear(1, 1): the "matmul" degenerates to a scalar multiply-add
    # broadcast over the tile.  Pure VPU work; do NOT route this to the MXU.
    w = w_ref[0, 0]
    b = b_ref[0]
    o_ref[...] = x_ref[...] * w + b


@jax.jit
def _linear_pallas(x, weight, bias):
    """Pallas path for large batches.  x: (N, 1) f32 -> (N, 1) f32."""
    n = x.shape[0]

    # Lane-dense view: (N, 1) -> (M, 128).  Pad only to the 1024-element
    # (8x128) tile granularity; skip the pad pass when already aligned.
    n_pad = _PAD_GRAN * pl.cdiv(n, _PAD_GRAN)
    padded = n_pad != n
    x_flat = x.reshape(n)
    if padded:
        x_flat = jnp.pad(x_flat, (0, n_pad - n))
    x2d = x_flat.reshape(n_pad // _LANES, _LANES)
    m = x2d.shape[0]                       # always a multiple of 8

    # Block height: as large as ~1 MiB, but leave >= _TARGET_GRID_STEPS steps
    # for megacore on large N, and never exceed the array itself.
    tm = min(_TM_MAX, m, max(_TM_MIN, 8 * pl.cdiv(m, 8 * _TARGET_GRID_STEPS)))
    grid = (pl.cdiv(m, tm),)               # trailing partial block handled by Pallas

    out2d = pl.pallas_call(
        linear_kernel,
        out_shape=jax.ShapeDtypeStruct((m, _LANES), x.dtype),
        grid=grid,
        in_specs=[
            pl.BlockSpec((tm, _LANES), lambda i: (i, 0)),        # x tile (VMEM)
            pl.BlockSpec(memory_space=pltpu.MemorySpace.SMEM),   # weight (1,1)
            pl.BlockSpec(memory_space=pltpu.MemorySpace.SMEM),   # bias (1,)
        ],
        out_specs=pl.BlockSpec((tm, _LANES), lambda i: (i, 0)),
        # Donate the padded temporary slab to the output.  In-place elementwise
        # is safe (block i is read before it is written back).  Only alias when
        # the input really is a temporary; otherwise XLA would insert a copy.
        input_output_aliases=({0: 0} if padded else {}),
        compiler_params=pltpu.CompilerParams(
            # no-op on single-TC v5e/v6e; shards grid steps across TCs on v7x
            dimension_semantics=("parallel",),
        ),
    )(x2d, weight, bias)

    # back to the PyTorch (batch, out_features=1) shape, dropping any pad
    return out2d.reshape(n_pad, 1)[:n]


def linear_regression_forward(x, weight, bias, *, min_pallas_batch=_SMALL_BATCH):
    """LinearRegressionModel.forward: x:(N,1), weight:(1,1), bias:(1,) -> (N,1)."""
    n = x.shape[0]
    if n < min_pallas_batch:
        # Small-batch fast path: one fused XLA elementwise op; kernel launch,
        # pad and slice would all be pure overhead here.
        return x * weight[0, 0] + bias[0]
    return _linear_pallas(x, weight, bias)


if __name__ == "__main__":
    key = jax.random.PRNGKey(0)
    kx, kw, kb = jax.random.split(key, 3)

    # nn.Linear(1, 1) init: U(-1/sqrt(in_features), 1/sqrt(in_features)) = U(-1, 1)
    weight = jax.random.uniform(kw, (1, 1), minval=-1.0, maxval=1.0, dtype=jnp.float32)
    bias = jax.random.uniform(kb, (1,), minval=-1.0, maxval=1.0, dtype=jnp.float32)

    def ref(v):
        return v @ weight.T + bias

    # 1) Pallas path, small non-aligned batch (2000 -> pads to 2048, 1 grid step).
    x = jax.random.normal(kx, (2000, 1), dtype=jnp.float32)
    out = linear_regression_forward(x, weight, bias, min_pallas_batch=0)
    jax.block_until_ready(out)
    assert out.shape == (2000, 1)
    assert jnp.allclose(out, ref(x), atol=1e-6), "Pallas path mismatch (batch=2000)"

    # 2) Pallas path, multi-step grid with a partial trailing block
    #    (40000 -> 40960 elems, m=320 rows, tm=256 -> grid=2).
    x_big = jax.random.normal(kx, (40000, 1), dtype=jnp.float32)
    out_big = linear_regression_forward(x_big, weight, bias, min_pallas_batch=0)
    jax.block_until_ready(out_big)
    assert jnp.allclose(out_big, ref(x_big), atol=1e-6), "Pallas path mismatch (grid>1)"

    # 3) Pallas path, tile-aligned batch (no pad pass, no aliasing).
    x_al = jax.random.normal(kx, (4096, 1), dtype=jnp.float32)
    out_al = linear_regression_forward(x_al, weight, bias, min_pallas_batch=0)
    jax.block_until_ready(out_al)
    assert jnp.allclose(out_al, ref(x_al), atol=1e-6), "Pallas path mismatch (aligned)"

    # 4) Dispatcher fast path (small batch -> fused XLA, no kernel launch).
    out_fast = linear_regression_forward(x, weight, bias)
    jax.block_until_ready(out_fast)
    assert jnp.allclose(out_fast, ref(x), atol=1e-6), "fast path mismatch"

    print("KERNEL_OK")
</pallas_src>

<mosaic_0001>
module attributes {stable_mosaic.version = 11 : i64} {
  func.func @linear_kernel(%arg0: i32, %arg1: memref<16x128xf32, #tpu.memory_space<vmem>>, %arg2: memref<1x1xf32, #tpu.memory_space<smem>>, %arg3: memref<1xf32, #tpu.memory_space<smem>>, %arg4: memref<16x128xf32, #tpu.memory_space<vmem>>) attributes {dimension_semantics = [#tpu.dimension_semantics<parallel>], iteration_bounds = array<i64: 1>, scalar_prefetch = 0 : i64, scratch_operands = 0 : i64, tpu.core_type = #tpu.core_type<tc>, window_params = [{transform_indices = @transform_0, window_bounds = array<i64: 16, 128>}, {transform_indices = @transform_1, window_bounds = array<i64: 1, 1>}, {transform_indices = @transform_2, window_bounds = array<i64: 1>}, {transform_indices = @transform_3, window_bounds = array<i64: 16, 128>}]} {
    %c0 = arith.constant 0 : index
    %c0_0 = arith.constant 0 : index
    %0 = memref.load %arg2[%c0, %c0_0] : memref<1x1xf32, #tpu.memory_space<smem>>
    %c0_1 = arith.constant 0 : index
    %1 = memref.load %arg3[%c0_1] : memref<1xf32, #tpu.memory_space<smem>>
    %c0_2 = arith.constant 0 : index
    %c0_3 = arith.constant 0 : index
    %2 = vector.load %arg1[%c0_2, %c0_3] : memref<16x128xf32, #tpu.memory_space<vmem>>, vector<16x128xf32>
    %3 = vector.broadcast %0 : f32 to vector<16x128xf32>
    %4 = arith.mulf %2, %3 : vector<16x128xf32>
    %5 = vector.broadcast %1 : f32 to vector<16x128xf32>
    %6 = arith.addf %4, %5 : vector<16x128xf32>
    %c0_4 = arith.constant 0 : index
    %c0_5 = arith.constant 0 : index
    %7 = vector.load %arg4[%c0_4, %c0_5] : memref<16x128xf32, #tpu.memory_space<vmem>>, vector<16x128xf32>
    tpu.vector_store %arg4[%c0_4, %c0_5], %6 {strides = array<i32>} : memref<16x128xf32, #tpu.memory_space<vmem>>, vector<16x128xf32>,
    return
  }
  func.func @transform_0(%arg0: i32) -> (i32, i32) {
    %c0_i32 = arith.constant 0 : i32
    %c0_i32_0 = arith.constant 0 : i32
    return %arg0, %c0_i32 : i32, i32
  }
  func.func @transform_1(%arg0: i32) -> (i32, i32) {
    %c0_i32 = arith.constant 0 : i32
    %c0_i32_0 = arith.constant 0 : i32
    %c0_i32_1 = arith.constant 0 : i32
    return %c0_i32, %c0_i32_0 : i32, i32
  }
  func.func @transform_2(%arg0: i32) -> i32 {
    %c0_i32 = arith.constant 0 : i32
    %c0_i32_0 = arith.constant 0 : i32
    return %c0_i32 : i32
  }
  func.func @transform_3(%arg0: i32) -> (i32, i32) {
    %c0_i32 = arith.constant 0 : i32
    %c0_i32_0 = arith.constant 0 : i32
    return %arg0, %c0_i32 : i32, i32
  }
}

</mosaic_0001>

<bundles_post_ra>
// kernel: _linear_pallas.1
= control target key start
LH: loop header
LB: loop body
LE: loop exit
PB: predicated region body
PF: predicated region fallthrough
CT: control target
= control target key end

     0   :  { %s70_s0 = inlined_call_operand.vmem [shape: f32[16,128], index: 0, kind: input, shape index: {}, may-alias: {0,3}]   ;;  %s71_s1 = inlined_call_operand.<no memory space> [shape: f32[1,1], index: 1, kind: input, shape index: {}]   ;;  %s72_s2 = inlined_call_operand.<no memory space> [shape: f32[1], index: 2, kind: input, shape index: {}]   ;;  %s73_s3 = inlined_call_operand.vmem [shape: f32[16,128], index: 3, kind: output, shape index: {}, may-alias: {0,3}]  }
   0x1   :  { %v18_v0 = vld [vmem:[%s70_s0] sm:$0xff]  ;;  %v20_v1 = vstv %s71_s1  ;;  %v23_v2 = vstv %s72_s2  ;;  %v19_v3 = vld [vmem:[%s70_s0 + $0x8] sm:$0xff] }
   0x2   :  { %v21_v4 = vmul.f32 %v20_v1, %v18_v0  ;;  %v22_v5 = vmul.f32 %v20_v1, %v19_v3 }
   0x4   :  { %v24_v6 = vadd.f32 %v23_v2, %v21_v4  ;;  %v25_v7 = vadd.f32 %v23_v2, %v22_v5 }
   0x6   :  { %26 = vst [vmem:[%s73_s3] sm:$0xff] %v24_v6  ;;  %27 = vst [vmem:[%s73_s3 + $0x8] sm:$0xff] %v25_v7 }

</bundles_post_ra>
